<compile_context>
chip_gen: v7x
topology: tpu7x:2x2x1
jax: 0.10.0
libtpu: 0.0.40
codegen_flags: <defaults>
</compile_context>

<pallas_src>
import jax
import jax.numpy as jnp
from jax.experimental import pallas as pl
from jax.experimental.pallas import tpu as pltpu

LEAKY_SLOPE = 0.2
BN_EPS = 1e-5
INIT_STD = 0.02


def _vec_row_layout(bn_flags):
    """Row offsets inside the f32 vector slab (compile-time Python ints)."""
    n_hidden = len(bn_flags)
    row = 0
    b_rows = [row]              # layer-1 bias
    row += 1
    bn_rows = [None]
    for i in range(1, n_hidden):
        b_rows.append(row)
        row += 1
        if bn_flags[i]:
            bn_rows.append((row, row + 1))
            row += 2
        else:
            bn_rows.append(None)
    wmean_row = row
    bmean_row = row + 1
    n_rows = row + 2
    return b_rows, bn_rows, wmean_row, bmean_row, n_rows


def _make_kernel(bn_flags, batch, d_src, d_tgt):
    """Fused MLP_D forward. Refs: (src, tgt, w_slab, vec_slab, out)."""
    n_hidden = len(bn_flags)
    assert n_hidden >= 1 and not bn_flags[0], "MLP_D never has BN on layer 1"
    inv_batch = 1.0 / float(batch)
    b_rows, bn_rows, wmean_row, bmean_row, _ = _vec_row_layout(bn_flags)

    def kernel(src_ref, tgt_ref, w_ref, vec_ref, out_ref):
        # ---- Layer 1: fused torch.cat via split weight (slab slots 0 and 1). --
        # Slab rows beyond d_src / d_tgt are zero, so the value slice is only a
        # load-size optimisation (d_src=16 is bf16 sublane-tile aligned here).
        w0s = w_ref[0][:d_src, :]                       # [d_src, Fmax] bf16
        w0t = w_ref[1][:d_tgt, :]                       # [d_tgt, Fmax] bf16
        b0 = vec_ref[pl.ds(b_rows[0], 1), :]            # [1, Fmax] f32
        h = (jnp.dot(src_ref[...].astype(jnp.bfloat16), w0s,
                     preferred_element_type=jnp.float32)
             + jnp.dot(tgt_ref[...].astype(jnp.bfloat16), w0t,
                       preferred_element_type=jnp.float32)
             + b0)
        h = jnp.maximum(h, LEAKY_SLOPE * h)             # LeakyReLU(0.2)

        # ---- Hidden layers 2..n: Linear -> BN (train mode) -> LeakyReLU. ----
        for i in range(1, n_hidden):
            w = w_ref[i + 1]                            # [Fmax, Fmax] bf16
            b = vec_ref[pl.ds(b_rows[i], 1), :]         # [1, Fmax] f32
            h = jnp.dot(h.astype(jnp.bfloat16), w,
                        preferred_element_type=jnp.float32) + b
            if bn_rows[i] is not None:
                g_row, be_row = bn_rows[i]
                gamma = vec_ref[pl.ds(g_row, 1), :]
                beta = vec_ref[pl.ds(be_row, 1), :]
                # Batch stats in one traversal of h (biased variance, f32).
                mu = jnp.mean(h, axis=0, keepdims=True)         # [1, Fmax]
                ex2 = jnp.mean(h * h, axis=0, keepdims=True)    # [1, Fmax]
                var = jnp.maximum(ex2 - mu * mu, 0.0)
                scale = gamma * jax.lax.rsqrt(var + BN_EPS)     # [1, Fmax]
                shift = beta - mu * scale                       # [1, Fmax]
                h = h * scale + shift
            h = jnp.maximum(h, LEAKY_SLOPE * h)

        # ---- Final Linear + global mean, no MXU op: -------------------------
        #   mean_{b,o}(h @ W_last + b_last)
        #     = (1/B) * (sum_b h) . mean_o(W_last) + mean_o(b_last)
        h_sum = jnp.sum(h, axis=0, keepdims=True)               # [1, Fmax]
        wmean = vec_ref[pl.ds(wmean_row, 1), :]                 # [1, Fmax]
        bmean = vec_ref[pl.ds(bmean_row, 1), :]                 # b_mean at lane 0
        contrib = h_sum * wmean * inv_batch + bmean
        out_ref[...] = jnp.sum(contrib, axis=1, keepdims=True)  # (1, 1)

    return kernel


def pack_params(params, bn_flags, d_src, d_tgt):
    """One-time parameter prep (NOT in the per-call path).

    Returns:
      w_slab  : [L, Fmax, Fmax] bf16  (W0_src, W0_tgt, W_1, ..., zero padded)
      vec_slab: [R_pad, Fmax]   f32   (b0, (b_i, gamma_i, beta_i)..., w_mean, b_mean)
    """
    n_hidden = len(bn_flags)
    w0, b0 = params[0], params[1]
    ninput = w0.shape[0]
    assert ninput == d_src + d_tgt

    hidden_ws, layer_biases, bn_params = [], [b0], [None]
    idx = 2
    for i in range(1, n_hidden):
        w, b = params[idx], params[idx + 1]
        idx += 2
        hidden_ws.append(w)
        layer_biases.append(b)
        if bn_flags[i]:
            bn_params.append((params[idx], params[idx + 1]))
            idx += 2
        else:
            bn_params.append(None)
    w_last, b_last = params[idx], params[idx + 1]

    dims = [d_src, d_tgt, w0.shape[1], w_last.shape[0]]
    for w in hidden_ws:
        dims += list(w.shape)
    fmax = max(128, ((max(dims) + 127) // 128) * 128)   # lane-dense common width

    def pad2(w):
        kin, kout = w.shape
        return jnp.pad(w, ((0, fmax - kin), (0, fmax - kout)))

    slab_pieces = [pad2(w0[:d_src]), pad2(w0[d_src:])] + [pad2(w) for w in hidden_ws]
    w_slab = jnp.stack(slab_pieces).astype(jnp.bfloat16)        # [L, Fmax, Fmax]

    def padrow(v):
        v = jnp.reshape(v, (-1,)).astype(jnp.float32)
        return jnp.pad(v, (0, fmax - v.shape[0]))

    rows = [padrow(layer_biases[0])]
    for i in range(1, n_hidden):
        rows.append(padrow(layer_biases[i]))
        if bn_params[i] is not None:
            g, bt = bn_params[i]
            rows.append(padrow(g))
            rows.append(padrow(bt))
    rows.append(padrow(jnp.mean(w_last, axis=1)))               # w_mean
    rows.append(jnp.zeros((fmax,), jnp.float32).at[0].set(jnp.mean(b_last)))  # b_mean

    b_rows, bn_rows, wmean_row, bmean_row, n_rows = _vec_row_layout(bn_flags)
    assert len(rows) == n_rows
    pad_rows = (-n_rows) % 8                                    # sublane-align
    rows += [jnp.zeros((fmax,), jnp.float32)] * pad_rows
    vec_slab = jnp.stack(rows)                                  # [R_pad, Fmax]
    return w_slab, vec_slab


def mlp_d_forward(source, target, w_slab, vec_slab, bn_flags, d_src, d_tgt):
    """Per-call forward. Only activations change per call; params are the
    pre-packed slabs from pack_params. Returns a scalar (float32)."""
    B = source.shape[0]
    kernel = _make_kernel(bn_flags, B, d_src, d_tgt)
    vmem = pl.BlockSpec(memory_space=pltpu.MemorySpace.VMEM)

    out = pl.pallas_call(
        kernel,
        out_shape=jax.ShapeDtypeStruct((1, 1), jnp.float32),
        in_specs=[vmem, vmem, vmem, vmem],
        out_specs=vmem,
        compiler_params=pltpu.CompilerParams(
            # Explicit scoped-VMEM budget; ample for these shapes on
            # v5e (16 MiB default) / v6e / v7x.  Re-derive if widths/batch scale.
            vmem_limit_bytes=32 * 1024 * 1024,
        ),
    )(source, target, w_slab, vec_slab)
    return out[0, 0]


def init_params(key, ninput, noutput, layers_str):
    """Deterministic init mirroring MLP_D.init_weights():
    weights ~ N(0, 0.02) (including BN gamma, per the torch try/except),
    biases (and BN beta) = 0."""
    layer_sizes = [ninput] + [int(x) for x in layers_str.split('-')]
    n_keys = 2 * len(layer_sizes) + 2
    keys = iter(jax.random.split(key, n_keys))

    params = []
    bn_flags = []
    for i in range(len(layer_sizes) - 1):
        fan_in, fan_out = layer_sizes[i], layer_sizes[i + 1]
        w = INIT_STD * jax.random.normal(next(keys), (fan_in, fan_out), jnp.float32)
        b = jnp.zeros((1, fan_out), jnp.float32)
        params += [w, b]
        if i != 0:
            gamma = INIT_STD * jax.random.normal(next(keys), (1, fan_out), jnp.float32)
            beta = jnp.zeros((1, fan_out), jnp.float32)
            params += [gamma, beta]
            bn_flags.append(True)
        else:
            bn_flags.append(False)

    w = INIT_STD * jax.random.normal(next(keys), (layer_sizes[-1], noutput), jnp.float32)
    b = jnp.zeros((1, noutput), jnp.float32)
    params += [w, b]
    return params, bn_flags


if __name__ == "__main__":
    key = jax.random.PRNGKey(0)
    k_src, k_tgt, k_par = jax.random.split(key, 3)

    # Small shapes consistent with the module's forward:
    #   source: [B, d_src], target: [B, d_tgt], ninput = d_src + d_tgt
    B, d_src, d_tgt = 8, 16, 16
    ninput = d_src + d_tgt
    noutput = 1
    layers = "64-32"   # hidden layer sizes, as in the torch constructor string

    source = jax.random.normal(k_src, (B, d_src), jnp.float32)
    target = jax.random.normal(k_tgt, (B, d_tgt), jnp.float32)

    params, bn_flags = init_params(k_par, ninput, noutput, layers)

    # One-time parameter packing (bf16 weight slab + f32 vector slab).
    w_slab, vec_slab = pack_params(params, bn_flags, d_src, d_tgt)
    jax.block_until_ready((w_slab, vec_slab))

    out = mlp_d_forward(source, target, w_slab, vec_slab, bn_flags, d_src, d_tgt)
    jax.block_until_ready(out)
    assert out.shape == ()            # scalar, like torch.mean(x)
    assert bool(jnp.isfinite(out))
    print("KERNEL_OK")
</pallas_src>

<mosaic_0001>
module attributes {stable_mosaic.version = 11 : i64} {
  func.func @kernel(%arg0: memref<8x16xf32, #tpu.memory_space<vmem>>, %arg1: memref<8x16xf32, #tpu.memory_space<vmem>>, %arg2: memref<3x128x128xbf16, #tpu.memory_space<vmem>>, %arg3: memref<8x128xf32, #tpu.memory_space<vmem>>, %arg4: memref<1x1xf32, #tpu.memory_space<vmem>>) attributes {dimension_semantics = [], scalar_prefetch = 0 : i64, scratch_operands = 0 : i64, tpu.core_type = #tpu.core_type<tc>} {
    %c0 = arith.constant 0 : index
    %c0_0 = arith.constant 0 : index
    %c0_1 = arith.constant 0 : index
    %0 = vector.load %arg2[%c0, %c0_0, %c0_1] : memref<3x128x128xbf16, #tpu.memory_space<vmem>>, vector<1x128x128xbf16>
    %1 = vector.shape_cast %0 : vector<1x128x128xbf16> to vector<128x128xbf16>
    %2 = vector.extract_strided_slice %1 {offsets = [0, 0], sizes = [16, 128], strides = [1, 1]} : vector<128x128xbf16> to vector<16x128xbf16>
    %c1 = arith.constant 1 : index
    %c0_2 = arith.constant 0 : index
    %c0_3 = arith.constant 0 : index
    %3 = vector.load %arg2[%c1, %c0_2, %c0_3] : memref<3x128x128xbf16, #tpu.memory_space<vmem>>, vector<1x128x128xbf16>
    %4 = vector.shape_cast %3 : vector<1x128x128xbf16> to vector<128x128xbf16>
    %5 = vector.extract_strided_slice %4 {offsets = [0, 0], sizes = [16, 128], strides = [1, 1]} : vector<128x128xbf16> to vector<16x128xbf16>
    %c0_4 = arith.constant 0 : index
    %c0_5 = arith.constant 0 : index
    %6 = vector.load %arg3[%c0_4, %c0_5] : memref<8x128xf32, #tpu.memory_space<vmem>>, vector<1x128xf32>
    %c0_6 = arith.constant 0 : index
    %c0_7 = arith.constant 0 : index
    %7 = vector.load %arg0[%c0_6, %c0_7] : memref<8x16xf32, #tpu.memory_space<vmem>>, vector<8x16xf32>
    %8 = arith.truncf %7 : vector<8x16xf32> to vector<8x16xbf16>
    %cst = arith.constant dense<0.000000e+00> : vector<8x128xf32>
    %9 = tpu.matmul %8, %2, %cst {dimension_numbers = #tpu.dot_dimension_numbers<[1], [0], [0], [1], [0, 0, 1, 1], [], []>} : vector<8x16xbf16>, vector<16x128xbf16>, vector<8x128xf32> -> vector<8x128xf32>
    %c0_8 = arith.constant 0 : index
    %c0_9 = arith.constant 0 : index
    %10 = vector.load %arg1[%c0_8, %c0_9] : memref<8x16xf32, #tpu.memory_space<vmem>>, vector<8x16xf32>
    %11 = arith.truncf %10 : vector<8x16xf32> to vector<8x16xbf16>
    %cst_10 = arith.constant dense<0.000000e+00> : vector<8x128xf32>
    %12 = tpu.matmul %11, %5, %cst_10 {dimension_numbers = #tpu.dot_dimension_numbers<[1], [0], [0], [1], [0, 0, 1, 1], [], []>} : vector<8x16xbf16>, vector<16x128xbf16>, vector<8x128xf32> -> vector<8x128xf32>
    %13 = arith.addf %9, %12 : vector<8x128xf32>
    %14 = vector.broadcast %6 : vector<1x128xf32> to vector<8x128xf32>
    %15 = arith.addf %13, %14 : vector<8x128xf32>
    %cst_11 = arith.constant 2.000000e-01 : f32
    %16 = vector.broadcast %cst_11 : f32 to vector<8x128xf32>
    %17 = arith.mulf %16, %15 : vector<8x128xf32>
    %18 = arith.maximumf %15, %17 : vector<8x128xf32>
    %c2 = arith.constant 2 : index
    %c0_12 = arith.constant 0 : index
    %c0_13 = arith.constant 0 : index
    %19 = vector.load %arg2[%c2, %c0_12, %c0_13] : memref<3x128x128xbf16, #tpu.memory_space<vmem>>, vector<1x128x128xbf16>
    %20 = vector.shape_cast %19 : vector<1x128x128xbf16> to vector<128x128xbf16>
    %c1_14 = arith.constant 1 : index
    %c0_15 = arith.constant 0 : index
    %21 = vector.load %arg3[%c1_14, %c0_15] : memref<8x128xf32, #tpu.memory_space<vmem>>, vector<1x128xf32>
    %22 = arith.truncf %18 : vector<8x128xf32> to vector<8x128xbf16>
    %cst_16 = arith.constant dense<0.000000e+00> : vector<8x128xf32>
    %23 = tpu.matmul %22, %20, %cst_16 {dimension_numbers = #tpu.dot_dimension_numbers<[1], [0], [0], [1], [0, 0, 1, 1], [], []>} : vector<8x128xbf16>, vector<128x128xbf16>, vector<8x128xf32> -> vector<8x128xf32>
    %24 = vector.broadcast %21 : vector<1x128xf32> to vector<8x128xf32>
    %25 = arith.addf %23, %24 : vector<8x128xf32>
    %c2_17 = arith.constant 2 : index
    %c0_18 = arith.constant 0 : index
    %26 = vector.load %arg3[%c2_17, %c0_18] : memref<8x128xf32, #tpu.memory_space<vmem>>, vector<1x128xf32>
    %c3 = arith.constant 3 : index
    %c0_19 = arith.constant 0 : index
    %27 = vector.load %arg3[%c3, %c0_19] : memref<8x128xf32, #tpu.memory_space<vmem>>, vector<1x128xf32>
    %cst_20 = arith.constant dense<0.000000e+00> : vector<128xf32>
    %28 = vector.multi_reduction <add>, %25, %cst_20 [0] : vector<8x128xf32> to vector<128xf32>
    %29 = vector.shape_cast %28 : vector<128xf32> to vector<1x128xf32>
    %cst_21 = arith.constant 8.000000e+00 : f32
    %30 = vector.broadcast %cst_21 : f32 to vector<1x128xf32>
    %31 = arith.divf %29, %30 : vector<1x128xf32>
    %32 = arith.mulf %25, %25 : vector<8x128xf32>
    %cst_22 = arith.constant dense<0.000000e+00> : vector<128xf32>
    %33 = vector.multi_reduction <add>, %32, %cst_22 [0] : vector<8x128xf32> to vector<128xf32>
    %34 = vector.shape_cast %33 : vector<128xf32> to vector<1x128xf32>
    %cst_23 = arith.constant 8.000000e+00 : f32
    %35 = vector.broadcast %cst_23 : f32 to vector<1x128xf32>
    %36 = arith.divf %34, %35 : vector<1x128xf32>
    %37 = arith.mulf %31, %31 : vector<1x128xf32>
    %38 = arith.subf %36, %37 : vector<1x128xf32>
    %cst_24 = arith.constant 0.000000e+00 : f32
    %39 = vector.broadcast %cst_24 : f32 to vector<1x128xf32>
    %40 = arith.maximumf %38, %39 : vector<1x128xf32>
    %cst_25 = arith.constant 9.99999974E-6 : f32
    %41 = vector.broadcast %cst_25 : f32 to vector<1x128xf32>
    %42 = arith.addf %40, %41 : vector<1x128xf32>
    %43 = math.rsqrt %42 : vector<1x128xf32>
    %44 = arith.mulf %26, %43 : vector<1x128xf32>
    %45 = arith.mulf %31, %44 : vector<1x128xf32>
    %46 = arith.subf %27, %45 : vector<1x128xf32>
    %47 = vector.broadcast %44 : vector<1x128xf32> to vector<8x128xf32>
    %48 = arith.mulf %25, %47 : vector<8x128xf32>
    %49 = vector.broadcast %46 : vector<1x128xf32> to vector<8x128xf32>
    %50 = arith.addf %48, %49 : vector<8x128xf32>
    %cst_26 = arith.constant 2.000000e-01 : f32
    %51 = vector.broadcast %cst_26 : f32 to vector<8x128xf32>
    %52 = arith.mulf %51, %50 : vector<8x128xf32>
    %53 = arith.maximumf %50, %52 : vector<8x128xf32>
    %cst_27 = arith.constant dense<0.000000e+00> : vector<128xf32>
    %54 = vector.multi_reduction <add>, %53, %cst_27 [0] : vector<8x128xf32> to vector<128xf32>
    %55 = vector.shape_cast %54 : vector<128xf32> to vector<1x128xf32>
    %c4 = arith.constant 4 : index
    %c0_28 = arith.constant 0 : index
    %56 = vector.load %arg3[%c4, %c0_28] : memref<8x128xf32, #tpu.memory_space<vmem>>, vector<1x128xf32>
    %c5 = arith.constant 5 : index
    %c0_29 = arith.constant 0 : index
    %57 = vector.load %arg3[%c5, %c0_29] : memref<8x128xf32, #tpu.memory_space<vmem>>, vector<1x128xf32>
    %58 = arith.mulf %55, %56 : vector<1x128xf32>
    %cst_30 = arith.constant 1.250000e-01 : f32
    %59 = vector.broadcast %cst_30 : f32 to vector<1x128xf32>
    %60 = arith.mulf %58, %59 : vector<1x128xf32>
    %61 = arith.addf %60, %57 : vector<1x128xf32>
    %cst_31 = arith.constant dense<0.000000e+00> : vector<1xf32>
    %62 = vector.multi_reduction <add>, %61, %cst_31 [1] : vector<1x128xf32> to vector<1xf32>
    %63 = vector.shape_cast %62 : vector<1xf32> to vector<1x1xf32>
    %c0_32 = arith.constant 0 : index
    %c0_33 = arith.constant 0 : index
    %64 = vector.load %arg4[%c0_32, %c0_33] : memref<1x1xf32, #tpu.memory_space<vmem>>, vector<1x1xf32>
    tpu.vector_store %arg4[%c0_32, %c0_33], %63 {strides = array<i32>} : memref<1x1xf32, #tpu.memory_space<vmem>>, vector<1x1xf32>,
    return
  }
}

</mosaic_0001>

<bundles_post_ra>
// kernel: tpu_custom_call.1
= control target key start
LH: loop header
LB: loop body
LE: loop exit
PB: predicated region body
PF: predicated region fallthrough
CT: control target
= control target key end

     0   :  { %9 = vsyncpa [#allocation3], 0  ;;  %s629_s0 = inlined_call_operand.hbm [shape: f32[8,16], index: 0, kind: input, shape index: {}]   ;;  %s630_s1 = inlined_call_operand.hbm [shape: f32[8,16], index: 1, kind: input, shape index: {}]   ;;  %s631_s2 = inlined_call_operand.hbm [shape: bf16[3,128,128], index: 2, kind: input, shape index: {}]   ;;  %s632_s3 = inlined_call_operand.vmem [shape: f32[8,128], index: 3, kind: input, shape index: {}]   ;;  %s633_s4 = inlined_call_operand.hbm [shape: f32[1,1], index: 4, kind: output, shape index: {}]  }
   0x1   :  { %10 = vsyncpa [#allocation6], 0 }
   0x2   :  { %11 = vsyncpa [#allocation4], 0  ;;  %s527_s15 = smov [#allocation5]   ;;  %s528_s17 = smov [#allocation2]  }
   0x3   :  { %s28_s16 = sshll.u32 %s527_s15, 4  ;;  %s18_s18 = sshll.u32 %s528_s17, 4  ;;  %s29_s16 = int_to_ptr.vmem [resolvable:$true] %s28_s16  ;;  %s19_s18 = int_to_ptr.vmem [resolvable:$true] %s18_s18 }
   0x4   :  { %s433_s21 = scalar_lea.hbm %s630_s1, 128 }
   0x5   :  { %p434_p0 = scmp.ne.s32.totalorder %s630_s1, %s433_s21  ;;  %p437_p1 = scmp.lt.u32.totalorder %s433_s21, %s630_s1 }
   0x7   :  { %p439_p2 = pnand %p437_p1, %p434_p0 }
   0x9   :  { %442 = shalt.err (!%p439_p2)
}
   0xa   :  { %s443_s26 = scalar_lea.vmem %s29_s16, 128  ;;  %p448_p4 = scmp.lt.s32.totalorder %s29_s16, %s29_s16 }
   0xb   :  { %p444_p3 = scmp.ne.s32.totalorder %s29_s16, %s443_s26  ;;  %p449_p5 = scmp.lt.s32.totalorder %s443_s26, %s443_s26 }
   0xd   :  { %p450_p6 = por %p449_p5, %p448_p4 }
   0xf   :  { %p451_p7 = pnand %p450_p6, %p444_p3 }
  0x11   :  { %454 = shalt.err (!%p451_p7)
}
  0x12   :  { %31 = dma.hbm_to_vmem [thread:$0]  %s630_s1, 128, %s29_s16, [#allocation6]  }
  0x13   :  { %s455_s5 = scalar_lea.hbm %s629_s0, 128 }
  0x14   :  { %p456_p8 = scmp.ne.s32.totalorder %s629_s0, %s455_s5  ;;  %p459_p9 = scmp.lt.u32.totalorder %s455_s5, %s629_s0 }
  0x16   :  { %p461_p10 = pnand %p459_p9, %p456_p8 }
  0x18   :  { %464 = shalt.err (!%p461_p10)
}
  0x19   :  { %s465_s10 = scalar_lea.vmem %s19_s18, 128  ;;  %p470_p12 = scmp.lt.s32.totalorder %s19_s18, %s19_s18 }
  0x1a   :  { %p466_p11 = scmp.ne.s32.totalorder %s19_s18, %s465_s10  ;;  %p471_p13 = scmp.lt.s32.totalorder %s465_s10, %s465_s10 }
  0x1c   :  { %p472_p0 = por %p471_p13, %p470_p12 }
  0x1e   :  { %p473_p1 = pnand %p472_p0, %p466_p11 }
  0x20   :  { %476 = shalt.err (!%p473_p1)
}
  0x21   :  { %21 = dma.hbm_to_vmem [thread:$0]  %s629_s0, 128, %s19_s18, [#allocation3]  }
  0x22   :  { %s529_s12 = smov [#allocation7]   ;;  %s477_s16 = scalar_lea.hbm %s631_s2, 3072 }
  0x23   :  { %s37_s13 = sshll.u32 %s529_s12, 4  ;;  %p478_p2 = scmp.ne.s32.totalorder %s631_s2, %s477_s16  ;;  %s38_s13 = int_to_ptr.vmem [resolvable:$true] %s37_s13 }
  0x24   :  { %p481_p3 = scmp.lt.u32.totalorder %s477_s16, %s631_s2 }
  0x26   :  { %p483_p4 = pnand %p481_p3, %p478_p2 }
  0x28   :  { %486 = shalt.err (!%p483_p4)
}
  0x29   :  { %s487_s22 = scalar_lea.vmem %s38_s13, 3072  ;;  %p492_p6 = scmp.lt.s32.totalorder %s38_s13, %s38_s13 }
  0x2a   :  { %p488_p5 = scmp.ne.s32.totalorder %s38_s13, %s487_s22  ;;  %p493_p7 = scmp.lt.s32.totalorder %s487_s22, %s487_s22 }
  0x2c   :  { %p494_p8 = por %p493_p7, %p492_p6 }
  0x2e   :  { %p495_p9 = pnand %p494_p8, %p488_p5 }
  0x30   :  { %498 = shalt.err (!%p495_p9)
}
  0x31   :  { %s530_s0 = smov 64   ;;  %s531_s18 = smov 4  }
  0x32   :  { %43 = dma.hbm_to_vmem [thread:$0]  %s631_s2, 3072, %s38_s13, [#allocation6], %s530_s0, %s530_s0, %s531_s18  }
  0x33   :  { %521 = dma.done.wait [#allocation3], 128  }
  0x34   :  { %522 = vsyncadd [#allocation3], 4294967168 }
  0x35   :  { %523 = dma.done.wait [#allocation6], 3200  }
  0x36   :  { %524 = vsyncadd [#allocation6], 4294964096  ;;  %v532_v0 = vmov 0.0   ;;  %vm533_vm0 = vmmov 0   ;;  %v421_v1 = vld [vmem:[#allocation7 + $0x40] sm:$0xff]   ;;  %v64_v2 = vld [vmem:[#allocation5] sm:$0xff]  ;;  %v309_v54 = vlaneseq }
  0x37   :  { %381 = vmatprep.subr.bf16.mxu1 %v532_v0  ;;  %383 = vmatprep.mubr.msk.bf16.mxu1 %vm533_vm0, %v532_v0  ;;  %v65_v3 = vpack.c.bf16 %v64_v2, %v64_v2  ;;  %vm72_vm1 = vcmask 130048   ;;  %v422_v4 = vld [vmem:[#allocation7] sm:$0xff]   ;;  %v62_v6 = vld [vmem:[#allocation2] sm:$0xff]  ;;  %v424_v7 = vld [vmem:[#allocation7 + $0x88] sm:$0xff]   ;;  %vm332_vm2 = vcmask 1040384   ;;  %s534_s10 = smov [#allocation8]  }
  0x38   :  { %393 = vmatprep.subr.bf16.mxu0 %v532_v0  ;;  %409 = vmatprep.mubr.msk.bf16.mxu0 %vm533_vm0, %v532_v0  ;;  %v423_v5 = vld [vmem:[#allocation7 + $0x80] sm:$0xff]   ;;  %v63_v8 = vpack.c.bf16 %v62_v6, %v62_v6  ;;  %v425_v9 = vld [vmem:[#allocation7 + $0x90] sm:$0xff]   ;;  %v426_v10 = vld [vmem:[#allocation7 + $0x98] sm:$0xff]   ;;  %v310_v55 = vshrl.u32 %v309_v54, 7  ;;  %s344_s1 = sshll.u32 %s534_s10, 4  ;;  %vm336_vm3 = vcmask 0   ;;  %s345_s1 = int_to_ptr.vmem [resolvable:$true] %s344_s1 }
  0x39   :  { %382 = vmatpush3.bf16.msra.mxu1 %v421_v1  ;;  %394 = vmatpush3.bf16.msra.mxu0 %v423_v5  ;;  %v427_v11 = vld [vmem:[#allocation7 + $0xa0] sm:$0xff]   ;;  %v428_v12 = vld [vmem:[#allocation7 + $0xa8] sm:$0xff]   ;;  %v429_v13 = vld [vmem:[#allocation7 + $0xb0] sm:$0xff]   ;;  %s499_s11 = scalar_lea.vmem %s345_s1, 16  ;;  %s503_s12 = scalar_lea.vmem %s345_s1, 32 }
  0x3a   :  { %387 = vmatprep.subr.bf16.mxu1 %v532_v0  ;;  %395 = vmatprep.subr.bf16.mxu0 %v532_v0  ;;  %v430_v14 = vld [vmem:[#allocation7 + $0xb8] sm:$0xff]   ;;  %v358_v19 = vld [vmem:[%s632_s3] ss:$0 sm:$0xff]  ;;  %v359_v29 = vld [vmem:[%s632_s3 + $0x1] ss:$0 sm:$0xff]  ;;  %v311_v57 = vsub.s32 0, %v310_v55  ;;  %p500_p10 = scmp.ne.s32.totalorder %s345_s1, %s499_s11  ;;  %p504_p11 = scmp.lt.s32.totalorder %s345_s1, %s345_s1 }
  0x3b   :  { %v283_v56 = vld [vmem:[%s632_s3 + $0x2] sm:$0x1]  ;;  %v284_v60 = vld [vmem:[%s632_s3 + $0x3] sm:$0x1]  ;;  %p505_p12 = scmp.lt.s32.totalorder %s503_s12, %s499_s11 }
  0x3c   :  { %384 = vmatmul.mubr.msk.bf16.vlgmr.msra.gmra.mrb[0].mxu1 %vm72_vm1, %v65_v3 }
  0x3d   :  { %388 = vmatpush3.bf16.msra.mxu1 %v422_v4  ;;  %389 = vmatprep.mubr.msk.bf16.mxu1 %vm533_vm0, %v532_v0  ;;  %p506_p13 = por %p505_p12, %p504_p11 }
  0x3e   :  { %396 = vmatpush3.bf16.msra.mxu0 %v424_v7 }
  0x3f   :  { %397 = vmatprep.subr.bf16.mxu0 %v532_v0  ;;  %p507_p0 = pnand %p506_p13, %p500_p10 }
  0x42   :  { %398 = vmatpush3.bf16.msra.mxu0 %v425_v9 }
  0x43   :  { %399 = vmatprep.subr.bf16.mxu0 %v532_v0 }
  0x44   :  { %390 = vmatmul.mubr.msk.bf16.vlgmr.msra.gmra.mrb[4].mxu1 %vm72_vm1, %v63_v8 }
  0x46   :  { %400 = vmatpush3.bf16.msra.mxu0 %v426_v10  ;;  %v327_v10 = vld [vmem:[%s632_s3 + $0x4] sm:$0x1] }
  0x47   :  { %401 = vmatprep.subr.bf16.mxu0 %v532_v0 }
  0x4a   :  { %402 = vmatpush3.bf16.msra.mxu0 %v427_v11 }
  0x4b   :  { %403 = vmatprep.subr.bf16.mxu0 %v532_v0 }
  0x4e   :  { %404 = vmatpush3.bf16.msra.mxu0 %v428_v12 }
  0x4f   :  { %405 = vmatprep.subr.bf16.mxu0 %v532_v0 }
  0x52   :  { %406 = vmatpush3.bf16.msra.mxu0 %v429_v13  ;;  %v328_v13 = vld [vmem:[%s632_s3 + $0x5] sm:$0x1] }
  0x53   :  { %407 = vmatprep.subr.bf16.mxu0 %v532_v0 }
  0x56   :  { %408 = vmatpush3.bf16.msra.mxu0 %v430_v14 }
 0x10f   :  { %v110_v15 = vpop.f32.mrb[0].mxu1 }
 0x110   :  { %v385_v16 = vpop.f32.mrb[1].mxu1 }
 0x111   :  { %v113_v17 = vpop.f32.mrb[2].mxu1 }
 0x112   :  { %v386_v18 = vpop.f32.mrb[3].mxu1 }
 0x117   :  { %v159_v20 = vpop.f32.mrb[4].mxu1 }
 0x118   :  { %v160_v21 = vadd.f32 %v159_v20, %v110_v15  ;;  %v391_v22 = vpop.f32.mrb[5].mxu1 }
 0x119   :  { %v162_v23 = vpop.f32.mrb[6].mxu1 }
 0x11a   :  { %v169_v24 = vadd.f32 %v358_v19, %v160_v21  ;;  %v392_v25 = vpop.f32.mrb[7].mxu1 }
 0x11c   :  { %v170_v26 = vmul.f32 0.2, %v169_v24 }
 0x11e   :  { %v171_v27 = vmax.f32 %v169_v24, %v170_v26 }
 0x120   :  { %v190_v28 = vpack.c.bf16 %v171_v27, %v171_v27 }
 0x122   :  { %410 = vmatmul.mubr.bf16.vlgmr.msra.gmra.mrb[0].mxu0 %v190_v28 }
 0x1f5   :  { %v277_v30 = vpop.f32.mrb[0].mxu0 }
 0x1f6   :  { %v278_v31 = vadd.f32 %v359_v29, %v277_v30  ;;  %v411_v32 = vpop.f32.mrb[1].mxu0 }
 0x1f7   :  { %v280_v33 = vpop.f32.mrb[2].mxu0 }
 0x1f8   :  { %v285_v34 = vrot.slane %v278_v31, 4  ;;  %v293_v35 = vmul.f32 %v278_v31, %v278_v31  ;;  %v412_v36 = vpop.f32.mrb[3].mxu0 }
 0x1fa   :  { %v286_v37 = vadd.f32 %v285_v34, %v278_v31  ;;  %v294_v38 = vrot.slane %v293_v35, 4 }
 0x1fc   :  { %v287_v39 = vrot.slane %v286_v37, 2  ;;  %v295_v40 = vadd.f32 %v294_v38, %v293_v35 }
 0x1fe   :  { %v288_v41 = vadd.f32 %v287_v39, %v286_v37  ;;  %v296_v42 = vrot.slane %v295_v40, 2 }
 0x200   :  { %v289_v43 = vrot.slane %v288_v41, 1  ;;  %v297_v44 = vadd.f32 %v296_v42, %v295_v40 }
 0x202   :  { %v290_v45 = vadd.f32 %v289_v43, %v288_v41  ;;  %v298_v46 = vrot.slane %v297_v44, 1 }
 0x204   :  { %v292_v47 = vmul.f32 0.125, %v290_v45  ;;  %v299_v48 = vadd.f32 %v298_v46, %v297_v44 }
 0x206   :  { %v300_v49 = vmul.f32 0.125, %v299_v48  ;;  %v301_v50 = vmul.f32 %v292_v47, %v292_v47 }
 0x208   :  { %v302_v51 = vsub.f32 %v300_v49, %v301_v50 }
 0x20a   :  { %v303_v52 = vmax.f32 %v302_v51, 0.0 }
 0x20c   :  { %v304_v53 = vadd.f32 1e-05, %v303_v52 }
 0x20e   :  { %431 = vrsqrt.f32 %v304_v53 }
 0x218   :  { %v432_v58 = vpop.eup %431 }
 0x219   :  { %v306_v59 = vmul.f32 %v432_v58, %v283_v56 }
 0x21b   :  { %v307_v61 = vmul.f32 %v306_v59, %v292_v47  ;;  %v312_v62 = vrot.slane %v306_v59, %v311_v57 }
 0x21d   :  { %v308_v63 = vsub.f32 %v284_v60, %v307_v61  ;;  %v313_v0 = vmul.f32 %v312_v62, %v278_v31 }
 0x21f   :  { %v317_v1 = vrot.slane %v308_v63, %v311_v57 }
 0x221   :  { %v318_v2 = vadd.f32 %v317_v1, %v313_v0 }
 0x223   :  { %v319_v3 = vmul.f32 0.2, %v318_v2 }
 0x225   :  { %v320_v4 = vmax.f32 %v318_v2, %v319_v3 }
 0x227   :  { %v321_v5 = vrot.slane %v320_v4, 4 }
 0x229   :  { %v322_v6 = vadd.f32 %v321_v5, %v320_v4 }
 0x22b   :  { %v323_v7 = vrot.slane %v322_v6, 2 }
 0x22d   :  { %v324_v8 = vadd.f32 %v323_v7, %v322_v6 }
 0x22f   :  { %v325_v9 = vrot.slane %v324_v8, 1 }
 0x231   :  { %v326_v11 = vadd.f32 %v325_v9, %v324_v8 }
 0x233   :  { %v329_v12 = vmul.f32 %v327_v10, %v326_v11 }
 0x235   :  { %v330_v14 = vmul.f32 0.125, %v329_v12 }
 0x237   :  { %v331_v15 = vadd.f32 %v330_v14, %v328_v13 }
 0x239   :  { %v333_v16 = vsel %vm332_vm2, %v331_v15, 0.0 }
 0x23a   :  { %334 = vadd.xlane.f32.xlu0 %v333_v16 }
 0x2c7   :  { %v335_v17 = vpop.xlane.xlu0 %334 }
 0x2c8   :  { %337 = vst.msk [vmem:[#allocation8] sm:$0x1] %vm336_vm3, %v335_v17 }
 0x2c9   :  { %510 = shalt.err (!%p507_p0)
}
 0x2ca   :  { %s511_s14 = scalar_lea.hbm %s633_s4, 16 }
 0x2cb   :  { %p512_p1 = scmp.ne.s32.totalorder %s633_s4, %s511_s14  ;;  %p515_p2 = scmp.lt.u32.totalorder %s511_s14, %s633_s4 }
 0x2cd   :  { %p517_p3 = pnand %p515_p2, %p512_p1 }
 0x2cf   :  { %520 = shalt.err (!%p517_p3)
}
 0x2d0   :  { %347 = dma.vmem_to_hbm [thread:$0]  %s345_s1, 16, %s633_s4, [#allocation4]  }
 0x2d1   :  { %525 = dma.done.wait [#allocation4], 16  }
 0x2d2   :  { %526 = vsyncadd [#allocation4], 4294967280 }
 0x2d3   :  { %351 = vsyncpa [#allocation3], 1 }
 0x2d4   :  { %352 = vsyncpa [#allocation6], 1 }
 0x2d5   :  { %353 = vsyncpa [#allocation4], 1 }

</bundles_post_ra>
